<compile_context>
chip_gen: v7x
topology: tpu7x:2x2x1
jax: 0.10.0
libtpu: 0.0.40
codegen_flags: <defaults>
</compile_context>

<pallas_src>
import math

import jax
import jax.numpy as jnp
from jax.experimental import pallas as pl
from jax.experimental.pallas import tpu as pltpu

_LANE = 128


def _round_up(n, m):
    return ((n + m - 1) // m) * m


def _vmem_budget_bytes():
    """~75% of physical VMEM (128 MiB on v5e/v6e, 64 MiB per TC on v7x)."""
    try:
        cap = int(pltpu.get_tpu_info().vmem_capacity_bytes)
        if cap > 0:
            return (3 * cap) // 4
    except Exception:
        pass
    return 48 * 1024 * 1024  # conservative fallback = 0.75 * 64 MiB (smallest generation)


def _num_tensorcores():
    """Best-effort: 2 TensorCores per chip on v7x, 1 on v5e/v6e."""
    try:
        kind = (jax.devices()[0].device_kind or "").lower()
        if "v7" in kind or "7x" in kind:
            return 2
    except Exception:
        pass
    return 1


def _resident_spec(shape):
    """Full-block, constant-index (resident) param spec; single-buffered when supported."""
    try:
        return pl.BlockSpec(shape, lambda i: (0, 0),
                            pipeline_mode=pl.Buffered(buffer_count=1))
    except Exception:  # older JAX without pipeline_mode / Buffered: fall back to default
        return pl.BlockSpec(shape, lambda i: (0, 0))


def _mlp_kernel(x_ref, *refs):
    """Fused transposed MLP.  refs = (w0, b0, ..., wL, bL, out_ref).

    x_ref : (in_dim, batch_tile)   -- batch on lanes
    w_l   : (out_features, in_features)  (torch nn.Linear layout)
    b_l   : (out_features, 1)
    out   : (output_dim, batch_tile)
    """
    out_ref = refs[-1]
    param_refs = refs[:-1]
    n_layers = len(param_refs) // 2

    h = x_ref[...]                                   # (in, batch_tile)
    for layer in range(n_layers):
        w = param_refs[2 * layer][...]               # (out, in)
        b = param_refs[2 * layer + 1][...]           # (out, 1)
        if h.dtype != w.dtype:                       # matched MXU operands (bf16 path stays bf16)
            h = h.astype(w.dtype)
        h = jnp.dot(w, h, preferred_element_type=jnp.float32)   # (out, batch_tile), f32 acc
        h = h + b.astype(jnp.float32)                # bias-add on the VPU in f32
        if layer < n_layers - 1:                     # ReLU on hidden layers only
            h = jnp.maximum(h, 0.0)
    out_ref[...] = h.astype(out_ref.dtype)


def _estimate_vmem_bytes(batch_tile, x_dtype, out_dtype, params):
    """Rough VMEM footprint (dtype-aware sublane padding, lane padding to 128)."""
    def sub(dtype):
        return 8 * max(1, 4 // jnp.dtype(dtype).itemsize)   # 8 f32 / 16 bf16 / 32 int8

    def tile_bytes(rows, cols, dtype):
        return (_round_up(rows, sub(dtype)) * _round_up(cols, _LANE)
                * jnp.dtype(dtype).itemsize)

    in_dim = params[0][0].shape[1]
    out_dim = params[-1][0].shape[0]
    total = 2 * tile_bytes(in_dim, batch_tile, x_dtype)      # double-buffered x^T tile
    total += 2 * tile_bytes(out_dim, batch_tile, out_dtype)  # double-buffered out^T tile
    for w, b in params:                                      # single-buffered resident params
        total += tile_bytes(w.shape[0], w.shape[1], w.dtype)
        total += tile_bytes(b.shape[0], 1, b.dtype)
    widest = max(w.shape[0] for w, _ in params)
    total += 2 * tile_bytes(widest, batch_tile, jnp.float32)  # live f32 activations
    return total


def _choose_batch_tile(batch):
    """Single grid step on 1-TC chips; >=2 parallel steps on v7x; cap at 2048 rows."""
    b_pad = _round_up(max(int(batch), 1), _LANE)
    n_cores = _num_tensorcores()
    if n_cores > 1 and b_pad > _LANE:
        tile = _round_up(pl.cdiv(b_pad, n_cores), _LANE)   # >=2 steps -> megacore sharding
    else:
        tile = b_pad                                       # 1 step: no per-step serial overhead
    return int(min(tile, 2048))


def dnn_forward(x, params, *, batch_tile=None, out_dtype=None):
    """Run the fused-MLP Pallas kernel.

    x:      (B, input_dim)
    params: list of (W, b) with W:(out_features, in_features) and b:(out_features, 1)
            (torch.nn.Linear layout).  f32 or bf16 on any generation.
    Returns (B, output_dim) in `out_dtype` (defaults to the param dtype).
    """
    B, in_dim = x.shape
    assert params[0][0].shape[1] == in_dim, "input_dim mismatch with first layer"
    out_dim = params[-1][0].shape[0]
    if out_dtype is None:
        out_dtype = params[-1][0].dtype

    if batch_tile is None:
        batch_tile = _choose_batch_tile(B)
    batch_tile = max(_LANE, _round_up(int(batch_tile), _LANE))   # batch lives on lanes

    budget = _vmem_budget_bytes()
    if _estimate_vmem_bytes(_LANE, x.dtype, out_dtype, params) > budget:
        # TODO(synk): K-tiled weight-streaming fallback with a VMEM f32 accumulator.
        raise ValueError("resident MLP weights exceed the VMEM budget; weight-streaming "
                         "fallback is not implemented for this model size")
    while (batch_tile > _LANE and
           _estimate_vmem_bytes(batch_tile, x.dtype, out_dtype, params) > budget):
        batch_tile = max(_LANE, _round_up(batch_tile // 2, _LANE))

    B_pad = pl.cdiv(B, batch_tile) * batch_tile

    # Lane-dense transposed layout: (in_dim, B_pad) with batch on the 128-lane axis.
    xt = x.T
    if B_pad != B:
        xt = jnp.pad(xt, ((0, 0), (0, B_pad - B)))

    grid = (B_pad // batch_tile,)

    in_specs = [pl.BlockSpec((in_dim, batch_tile), lambda i: (0, i))]
    flat_params = []
    for (w, b) in params:
        in_specs.append(_resident_spec(w.shape))
        in_specs.append(_resident_spec(b.shape))
        flat_params.extend([w, b])

    out_specs = pl.BlockSpec((out_dim, batch_tile), lambda i: (0, i))

    out_t = pl.pallas_call(
        _mlp_kernel,
        out_shape=jax.ShapeDtypeStruct((out_dim, B_pad), out_dtype),
        grid=grid,
        in_specs=in_specs,
        out_specs=out_specs,
        compiler_params=pltpu.CompilerParams(
            dimension_semantics=("parallel",),        # batch steps independent -> v7x megacore
            vmem_limit_bytes=int(budget)),
    )(xt, *flat_params)

    out = out_t.T                                     # back to (B_pad, output_dim)
    return out[:B] if B_pad != B else out


def init_dnn_params(key, input_dim, width, depth, output_dim, dtype=jnp.float32):
    """torch.nn.Linear-style init: W:(out,in), b:(out,1), U(-1/sqrt(fan_in), 1/sqrt(fan_in)).

    bf16 params are supported on all generations (v5e/v6e/v7x MXUs natively consume bf16;
    the kernel accumulates in f32).
    """
    dims = [input_dim] + [width] * depth + [output_dim]
    params = []
    for i in range(len(dims) - 1):
        fan_in, fan_out = dims[i], dims[i + 1]
        key, kw, kb = jax.random.split(key, 3)
        bound = 1.0 / math.sqrt(fan_in)
        w = jax.random.uniform(kw, (fan_out, fan_in), jnp.float32, -bound, bound)
        b = jax.random.uniform(kb, (fan_out, 1), jnp.float32, -bound, bound)
        params.append((w.astype(dtype), b.astype(dtype)))
    return params


def dnn_forward_ref(x, params):
    """Pure-JAX f32 reference for correctness checking."""
    h = x.astype(jnp.float32)
    for i, (w, b) in enumerate(params):
        h = h @ w.astype(jnp.float32).T + b.astype(jnp.float32).reshape(1, -1)
        if i < len(params) - 1:
            h = jnp.maximum(h, 0.0)
    return h


if __name__ == "__main__":
    # Small shapes consistent with the module: tabular recourse MLP.
    batch, input_dim, width, depth, output_dim = 50, 16, 32, 3, 2

    key = jax.random.PRNGKey(0)
    key, kx, kx2 = jax.random.split(key, 3)
    x = jax.random.normal(kx, (batch, input_dim), jnp.float32)
    params = init_dnn_params(key, input_dim, width, depth, output_dim, dtype=jnp.float32)
    ref = dnn_forward_ref(x, params)

    # Default path: batch 50 -> one 128-lane tile (single grid step), lane-dense store.
    out = jax.block_until_ready(dnn_forward(x, params))
    assert out.shape == (batch, output_dim)
    assert out.dtype == jnp.float32
    assert jnp.allclose(out, ref, atol=1e-5, rtol=1e-5), "mismatch vs. reference (default)"

    # Tiny-batch path (padding to one lane-width tile, padded cols sliced off).
    out_small = jax.block_until_ready(dnn_forward(x[:3], params))
    assert jnp.allclose(out_small, ref[:3], atol=1e-5, rtol=1e-5), "mismatch (tiny batch)"

    # Multi-step pipelined grid path (explicit 128-row tile, 300 -> padded 384 -> 3 steps).
    x_big = jax.random.normal(kx2, (300, input_dim), jnp.float32)
    ref_big = dnn_forward_ref(x_big, params)
    out_big = jax.block_until_ready(dnn_forward(x_big, params, batch_tile=128))
    assert jnp.allclose(out_big, ref_big, atol=1e-5, rtol=1e-5), "mismatch (multi-step grid)"

    # bf16 params: operands fed to the MXU in bf16, f32 accumulation, bf16 output.
    params_bf16 = [(w.astype(jnp.bfloat16), b.astype(jnp.bfloat16)) for w, b in params]
    out_bf16 = jax.block_until_ready(dnn_forward(x, params_bf16))
    assert out_bf16.dtype == jnp.bfloat16
    assert jnp.allclose(out_bf16.astype(jnp.float32), ref, atol=1e-1, rtol=1e-1), \
        "mismatch (bf16 path)"

    print("KERNEL_OK")
</pallas_src>

<mosaic_0001>
module attributes {stable_mosaic.version = 11 : i64} {
  func.func @_mlp_kernel(%arg0: i32, %arg1: memref<16x128xf32, #tpu.memory_space<vmem>>, %arg2: memref<32x16xf32, #tpu.memory_space<vmem>>, %arg3: memref<32x1xf32, #tpu.memory_space<vmem>>, %arg4: memref<32x32xf32, #tpu.memory_space<vmem>>, %arg5: memref<32x1xf32, #tpu.memory_space<vmem>>, %arg6: memref<32x32xf32, #tpu.memory_space<vmem>>, %arg7: memref<32x1xf32, #tpu.memory_space<vmem>>, %arg8: memref<2x32xf32, #tpu.memory_space<vmem>>, %arg9: memref<2x1xf32, #tpu.memory_space<vmem>>, %arg10: memref<2x128xf32, #tpu.memory_space<vmem>>) attributes {dimension_semantics = [#tpu.dimension_semantics<parallel>], iteration_bounds = array<i64: 1>, scalar_prefetch = 0 : i64, scratch_operands = 0 : i64, tpu.core_type = #tpu.core_type<tc>, window_params = [{transform_indices = @transform_0, window_bounds = array<i64: 16, 128>}, {pipeline_mode = #tpu.pipeline_mode<synchronous>, transform_indices = @transform_1, window_bounds = array<i64: 32, 16>}, {pipeline_mode = #tpu.pipeline_mode<synchronous>, transform_indices = @transform_2, window_bounds = array<i64: 32, 1>}, {pipeline_mode = #tpu.pipeline_mode<synchronous>, transform_indices = @transform_3, window_bounds = array<i64: 32, 32>}, {pipeline_mode = #tpu.pipeline_mode<synchronous>, transform_indices = @transform_4, window_bounds = array<i64: 32, 1>}, {pipeline_mode = #tpu.pipeline_mode<synchronous>, transform_indices = @transform_5, window_bounds = array<i64: 32, 32>}, {pipeline_mode = #tpu.pipeline_mode<synchronous>, transform_indices = @transform_6, window_bounds = array<i64: 32, 1>}, {pipeline_mode = #tpu.pipeline_mode<synchronous>, transform_indices = @transform_7, window_bounds = array<i64: 2, 32>}, {pipeline_mode = #tpu.pipeline_mode<synchronous>, transform_indices = @transform_8, window_bounds = array<i64: 2, 1>}, {transform_indices = @transform_9, window_bounds = array<i64: 2, 128>}]} {
    %c0 = arith.constant 0 : index
    %c0_0 = arith.constant 0 : index
    %0 = vector.load %arg1[%c0, %c0_0] : memref<16x128xf32, #tpu.memory_space<vmem>>, vector<16x128xf32>
    %c0_1 = arith.constant 0 : index
    %c0_2 = arith.constant 0 : index
    %1 = vector.load %arg2[%c0_1, %c0_2] : memref<32x16xf32, #tpu.memory_space<vmem>>, vector<32x16xf32>
    %c0_3 = arith.constant 0 : index
    %c0_4 = arith.constant 0 : index
    %2 = vector.load %arg3[%c0_3, %c0_4] : memref<32x1xf32, #tpu.memory_space<vmem>>, vector<32x1xf32>
    %cst = arith.constant dense<0.000000e+00> : vector<32x128xf32>
    %3 = tpu.matmul %1, %0, %cst {dimension_numbers = #tpu.dot_dimension_numbers<[1], [0], [0], [1], [0, 0, 1, 1], [], []>} : vector<32x16xf32>, vector<16x128xf32>, vector<32x128xf32> -> vector<32x128xf32>
    %4 = vector.broadcast %2 : vector<32x1xf32> to vector<32x128xf32>
    %5 = arith.addf %3, %4 : vector<32x128xf32>
    %cst_5 = arith.constant 0.000000e+00 : f32
    %6 = vector.broadcast %cst_5 : f32 to vector<32x128xf32>
    %7 = arith.maximumf %5, %6 : vector<32x128xf32>
    %c0_6 = arith.constant 0 : index
    %c0_7 = arith.constant 0 : index
    %8 = vector.load %arg4[%c0_6, %c0_7] : memref<32x32xf32, #tpu.memory_space<vmem>>, vector<32x32xf32>
    %c0_8 = arith.constant 0 : index
    %c0_9 = arith.constant 0 : index
    %9 = vector.load %arg5[%c0_8, %c0_9] : memref<32x1xf32, #tpu.memory_space<vmem>>, vector<32x1xf32>
    %cst_10 = arith.constant dense<0.000000e+00> : vector<32x128xf32>
    %10 = tpu.matmul %8, %7, %cst_10 {dimension_numbers = #tpu.dot_dimension_numbers<[1], [0], [0], [1], [0, 0, 1, 1], [], []>} : vector<32x32xf32>, vector<32x128xf32>, vector<32x128xf32> -> vector<32x128xf32>
    %11 = vector.broadcast %9 : vector<32x1xf32> to vector<32x128xf32>
    %12 = arith.addf %10, %11 : vector<32x128xf32>
    %cst_11 = arith.constant 0.000000e+00 : f32
    %13 = vector.broadcast %cst_11 : f32 to vector<32x128xf32>
    %14 = arith.maximumf %12, %13 : vector<32x128xf32>
    %c0_12 = arith.constant 0 : index
    %c0_13 = arith.constant 0 : index
    %15 = vector.load %arg6[%c0_12, %c0_13] : memref<32x32xf32, #tpu.memory_space<vmem>>, vector<32x32xf32>
    %c0_14 = arith.constant 0 : index
    %c0_15 = arith.constant 0 : index
    %16 = vector.load %arg7[%c0_14, %c0_15] : memref<32x1xf32, #tpu.memory_space<vmem>>, vector<32x1xf32>
    %cst_16 = arith.constant dense<0.000000e+00> : vector<32x128xf32>
    %17 = tpu.matmul %15, %14, %cst_16 {dimension_numbers = #tpu.dot_dimension_numbers<[1], [0], [0], [1], [0, 0, 1, 1], [], []>} : vector<32x32xf32>, vector<32x128xf32>, vector<32x128xf32> -> vector<32x128xf32>
    %18 = vector.broadcast %16 : vector<32x1xf32> to vector<32x128xf32>
    %19 = arith.addf %17, %18 : vector<32x128xf32>
    %cst_17 = arith.constant 0.000000e+00 : f32
    %20 = vector.broadcast %cst_17 : f32 to vector<32x128xf32>
    %21 = arith.maximumf %19, %20 : vector<32x128xf32>
    %c0_18 = arith.constant 0 : index
    %c0_19 = arith.constant 0 : index
    %22 = vector.load %arg8[%c0_18, %c0_19] : memref<2x32xf32, #tpu.memory_space<vmem>>, vector<2x32xf32>
    %c0_20 = arith.constant 0 : index
    %c0_21 = arith.constant 0 : index
    %23 = vector.load %arg9[%c0_20, %c0_21] : memref<2x1xf32, #tpu.memory_space<vmem>>, vector<2x1xf32>
    %cst_22 = arith.constant dense<0.000000e+00> : vector<2x128xf32>
    %24 = tpu.matmul %22, %21, %cst_22 {dimension_numbers = #tpu.dot_dimension_numbers<[1], [0], [0], [1], [0, 0, 1, 1], [], []>} : vector<2x32xf32>, vector<32x128xf32>, vector<2x128xf32> -> vector<2x128xf32>
    %25 = vector.broadcast %23 : vector<2x1xf32> to vector<2x128xf32>
    %26 = arith.addf %24, %25 : vector<2x128xf32>
    %c0_23 = arith.constant 0 : index
    %c0_24 = arith.constant 0 : index
    %27 = vector.load %arg10[%c0_23, %c0_24] : memref<2x128xf32, #tpu.memory_space<vmem>>, vector<2x128xf32>
    tpu.vector_store %arg10[%c0_23, %c0_24], %26 {strides = array<i32>} : memref<2x128xf32, #tpu.memory_space<vmem>>, vector<2x128xf32>,
    return
  }
  func.func @transform_0(%arg0: i32) -> (i32, i32) {
    %c0_i32 = arith.constant 0 : i32
    %c0_i32_0 = arith.constant 0 : i32
    return %c0_i32, %arg0 : i32, i32
  }
  func.func @transform_1(%arg0: i32) -> (i32, i32) {
    %c0_i32 = arith.constant 0 : i32
    %c0_i32_0 = arith.constant 0 : i32
    %c0_i32_1 = arith.constant 0 : i32
    return %c0_i32, %c0_i32_0 : i32, i32
  }
  func.func @transform_2(%arg0: i32) -> (i32, i32) {
    %c0_i32 = arith.constant 0 : i32
    %c0_i32_0 = arith.constant 0 : i32
    %c0_i32_1 = arith.constant 0 : i32
    return %c0_i32, %c0_i32_0 : i32, i32
  }
  func.func @transform_3(%arg0: i32) -> (i32, i32) {
    %c0_i32 = arith.constant 0 : i32
    %c0_i32_0 = arith.constant 0 : i32
    %c0_i32_1 = arith.constant 0 : i32
    return %c0_i32, %c0_i32_0 : i32, i32
  }
  func.func @transform_4(%arg0: i32) -> (i32, i32) {
    %c0_i32 = arith.constant 0 : i32
    %c0_i32_0 = arith.constant 0 : i32
    %c0_i32_1 = arith.constant 0 : i32
    return %c0_i32, %c0_i32_0 : i32, i32
  }
  func.func @transform_5(%arg0: i32) -> (i32, i32) {
    %c0_i32 = arith.constant 0 : i32
    %c0_i32_0 = arith.constant 0 : i32
    %c0_i32_1 = arith.constant 0 : i32
    return %c0_i32, %c0_i32_0 : i32, i32
  }
  func.func @transform_6(%arg0: i32) -> (i32, i32) {
    %c0_i32 = arith.constant 0 : i32
    %c0_i32_0 = arith.constant 0 : i32
    %c0_i32_1 = arith.constant 0 : i32
    return %c0_i32, %c0_i32_0 : i32, i32
  }
  func.func @transform_7(%arg0: i32) -> (i32, i32) {
    %c0_i32 = arith.constant 0 : i32
    %c0_i32_0 = arith.constant 0 : i32
    %c0_i32_1 = arith.constant 0 : i32
    return %c0_i32, %c0_i32_0 : i32, i32
  }
  func.func @transform_8(%arg0: i32) -> (i32, i32) {
    %c0_i32 = arith.constant 0 : i32
    %c0_i32_0 = arith.constant 0 : i32
    %c0_i32_1 = arith.constant 0 : i32
    return %c0_i32, %c0_i32_0 : i32, i32
  }
  func.func @transform_9(%arg0: i32) -> (i32, i32) {
    %c0_i32 = arith.constant 0 : i32
    %c0_i32_0 = arith.constant 0 : i32
    return %c0_i32, %arg0 : i32, i32
  }
}

</mosaic_0001>

<bundles_post_ra>
// kernel: tpu_custom_call.1
= control target key start
LH: loop header
LB: loop body
LE: loop exit
PB: predicated region body
PF: predicated region fallthrough
CT: control target
= control target key end

     0   :  { %vm63_vm0 = vcmask 130048   ;;  %v665_v4 = vmov 0   ;;  %s829_s0 = inlined_call_operand.vmem [shape: f32[16,128], index: 0, kind: input, shape index: {}]   ;;  %s830_s1 = inlined_call_operand.vmem [shape: f32[32,16], index: 1, kind: input, shape index: {}]   ;;  %s831_s2 = inlined_call_operand.vmem [shape: f32[32,1], index: 2, kind: input, shape index: {}]   ;;  %s832_s3 = inlined_call_operand.vmem [shape: f32[32,32], index: 3, kind: input, shape index: {}]   ;;  %s833_s4 = inlined_call_operand.vmem [shape: f32[32,1], index: 4, kind: input, shape index: {}]   ;;  %s834_s5 = inlined_call_operand.vmem [shape: f32[32,32], index: 5, kind: input, shape index: {}]   ;;  %s835_s6 = inlined_call_operand.vmem [shape: f32[32,1], index: 6, kind: input, shape index: {}]   ;;  %s836_s7 = inlined_call_operand.vmem [shape: f32[2,32], index: 7, kind: input, shape index: {}]   ;;  %s837_s8 = inlined_call_operand.vmem [shape: f32[2,1], index: 8, kind: input, shape index: {}]   ;;  %s838_s9 = inlined_call_operand.hbm [shape: f32[2,128], index: 9, kind: output, shape index: {}]  }
   0x1   :  { %v33_v0 = vld [vmem:[%s829_s0] sm:$0xff]  ;;  %v34_v1 = vld [vmem:[%s829_s0 + $0x8] sm:$0xff]  ;;  %639 = vset.pattern.permute.xlu0 %v665_v4  ;;  %640 = vset.pattern.permute.xlu1 %v665_v4  ;;  %v41_v6 = vld [vmem:[%s831_s2 + $0x10] sm:$0xff] }
   0x2   :  { %v35_v2 = vld [vmem:[%s830_s1] sm:$0xff]  ;;  %v608_v3 = vpack.c.bf16 %v34_v1, %v33_v0  ;;  %v36_v7 = vld [vmem:[%s830_s1 + $0x8] sm:$0xff]  ;;  %55 = vperm.xlu1 %640, %v41_v6   ;;  %v37_v9 = vld [vmem:[%s830_s1 + $0x10] sm:$0xff] }
   0x3   :  { %563 = vmatprep.mubr.msk.f32.mxu0 %vm63_vm0, %v35_v2  ;;  %v39_v5 = vld [vmem:[%s831_s2] sm:$0xff]  ;;  %v40_v8 = vld [vmem:[%s831_s2 + $0x8] sm:$0xff]  ;;  %v42_v10 = vld [vmem:[%s831_s2 + $0x18] sm:$0xff] }
   0x4   :  { %609 = vmatprep.subr.bf16.mxu0 %v608_v3  ;;  %45 = vperm.xlu0 %639, %v39_v5  }
   0x5   :  { %611 = vmatpush3.bf16.msra.mxu0 %v608_v3 }
   0x6   :  { %14 = vsyncpa [#allocation3], 0  ;;  %v38_v11 = vld [vmem:[%s830_s1 + $0x18] sm:$0xff]  ;;  %v169_v12 = vld [vmem:[%s833_s4] sm:$0xff]  ;;  %60 = vperm.xlu1 %640, %v42_v10   ;;  %vm193_vm1 = vcmask 261120   ;;  %v666_v1 = vmov 0.0|0.0  }
   0x7   :  { %v170_v13 = vld [vmem:[%s833_s4 + $0x8] sm:$0xff]  ;;  %v171_v14 = vld [vmem:[%s833_s4 + $0x10] sm:$0xff]  ;;  %v172_v15 = vld [vmem:[%s833_s4 + $0x18] sm:$0xff]  ;;  %vm667_vm2 = vmmov 0   ;;  %v668_v2 = vmov 0.0   ;;  %s669_s13 = smov [#allocation2]  }
   0x8   :  { %564 = vmatmul.mubr.msk.f32.vlgmr.msra.gmra.mrb[0].mxu0 %vm63_vm0, %v36_v7  ;;  %50 = vperm.xlu0 %639, %v40_v8   ;;  %v299_v16 = vld [vmem:[%s835_s6] sm:$0xff]  ;;  %v300_v17 = vld [vmem:[%s835_s6 + $0x8] sm:$0xff]  ;;  %v301_v18 = vld [vmem:[%s835_s6 + $0x10] sm:$0xff]  ;;  %s511_s1 = sshll.u32 %s669_s13, 4  ;;  %s512_s1 = int_to_ptr.vmem [resolvable:$true] %s511_s1 }
   0x9   :  { %566 = vmatprep.mubr.msk.f32.mxu0 %vm63_vm0, %v37_v9  ;;  %v302_v19 = vld [vmem:[%s835_s6 + $0x18] sm:$0xff]  ;;  %v425_v20 = vld [vmem:[%s837_s8] sm:$0x3]  ;;  %v166_v40 = vld [vmem:[%s832_s3 + $0x8] sm:$0xff]  ;;  %s641_s14 = scalar_lea.vmem %s512_s1, 32  ;;  %p646_p1 = scmp.lt.s32.totalorder %s512_s1, %s512_s1 }
   0xa   :  { %180 = vperm.xlu1 %640, %v170_v13   ;;  %v165_v21 = vld [vmem:[%s832_s3] sm:$0xff]  ;;  %v167_v41 = vld [vmem:[%s832_s3 + $0x10] sm:$0xff]  ;;  %v168_v42 = vld [vmem:[%s832_s3 + $0x18] sm:$0xff]  ;;  %p642_p0 = scmp.ne.s32.totalorder %s512_s1, %s641_s14  ;;  %p647_p2 = scmp.lt.s32.totalorder %s641_s14, %s641_s14 }
   0xb   :  { %577 = vmatprep.mubr.msk.f32.mxu1 %vm193_vm1, %v165_v21  ;;  %v295_v43 = vld [vmem:[%s834_s5] sm:$0xff]  ;;  %v296_v62 = vld [vmem:[%s834_s5 + $0x8] sm:$0xff]  ;;  %v297_v63 = vld [vmem:[%s834_s5 + $0x10] sm:$0xff] }
   0xc   :  { %567 = vmatmul.mubr.msk.f32.gmra.mrb[2].mxu0 %vm63_vm0, %v38_v11  ;;  %175 = vperm.xlu0 %639, %v169_v12   ;;  %v298_v0 = vld [vmem:[%s834_s5 + $0x18] sm:$0xff]  ;;  %v424_v21 = vld [vmem:[%s836_s7] sm:$0x3]  ;;  %p648_p3 = por %p647_p2, %p646_p1 }
   0xd   :  { %591 = vmatprep.mubr.msk.f32.mxu0 %vm193_vm1, %v295_v43 }
   0xe   :  { %190 = vperm.xlu1 %640, %v172_v15   ;;  %p649_p4 = pnand %p648_p3, %p642_p0 }
  0x10   :  { %185 = vperm.xlu0 %639, %v171_v14  }
  0x12   :  { %310 = vperm.xlu1 %640, %v300_v17  }
  0x14   :  { %305 = vperm.xlu0 %639, %v299_v16  }
  0x16   :  { %320 = vperm.xlu1 %640, %v302_v19  }
  0x18   :  { %315 = vperm.xlu0 %639, %v301_v18  }
  0x1c   :  { %428 = vperm.xlu0 %639, %v425_v20  }
  0x81   :  { %v56_v23 = vpop.permute.xlu1 %55 }
  0x83   :  { %v46_v22 = vpop.permute.xlu0 %45 }
  0x85   :  { %v61_v30 = vpop.permute.xlu1 %60 }
  0x87   :  { %v51_v24 = vpop.permute.xlu0 %50 }
  0x89   :  { %v181_v44 = vpop.permute.xlu1 %180 }
  0x8b   :  { %v176_v45 = vpop.permute.xlu0 %175 }
  0x8d   :  { %v191_v51 = vpop.permute.xlu1 %190 }
  0x8f   :  { %v186_v54 = vpop.permute.xlu0 %185 }
  0x91   :  { %v311_v3 = vpop.permute.xlu1 %310 }
  0x93   :  { %v306_v4 = vpop.permute.xlu0 %305 }
  0x95   :  { %v321_v10 = vpop.permute.xlu1 %320 }
  0x97   :  { %v316_v13 = vpop.permute.xlu0 %315 }
  0xdb   :  { %v565_v25 = vpop.f32.mrb[0].mxu0 }
  0xdc   :  { %v148_v26 = vadd.f32 %v565_v25, %v51_v24  ;;  %v142_v27 = vpop.f32.mrb[1].mxu0 }
  0xdd   :  { %v143_v28 = vadd.f32 %v142_v27, %v46_v22  ;;  %v429_v22 = vpop.permute.xlu0 %428 }
  0xde   :  { %v162_v29 = vmax.f32 %v148_v26, 0.0 }
  0xdf   :  { %v161_v31 = vmax.f32 %v143_v28, 0.0  ;;  %v568_v32 = vpop.f32.mrb[2].mxu0 }
  0xe0   :  { %v158_v33 = vadd.f32 %v568_v32, %v61_v30  ;;  %v152_v34 = vpop.f32.mrb[3].mxu0 }
  0xe1   :  { %v153_v35 = vadd.f32 %v152_v34, %v56_v23  ;;  %v612_v36 = vpack.c.bf16 %v162_v29, %v161_v31 }
  0xe2   :  { %v164_v37 = vmax.f32 %v158_v33, 0.0 }
  0xe3   :  { %v163_v38 = vmax.f32 %v153_v35, 0.0  ;;  %613 = vmatprep.subr.bf16.mxu1 %v612_v36 }
  0xe4   :  { %615 = vmatpush3.bf16.msra.mxu1 %v612_v36 }
  0xe5   :  { %v616_v39 = vpack.c.bf16 %v164_v37, %v163_v38 }
  0xe7   :  { %617 = vmatprep.subr.bf16.mxu1 %v616_v39 }
  0xe8   :  { %619 = vmatpush3.bf16.msra.mxu1 %v616_v39 }
  0xe9   :  { %628 = vmatprep.subr.bf16.mxu1 %v666_v1 }
  0xeb   :  { %578 = vmatmul.mubr.msk.f32.vlgmr.msra.gmra.mrb[0].mxu1 %vm193_vm1, %v166_v40 }
  0xec   :  { %580 = vmatprep.mubr.msk.f32.mxu1 %vm193_vm1, %v167_v41 }
  0xef   :  { %581 = vmatmul.mubr.msk.f32.gmra.mrb[2].mxu1 %vm193_vm1, %v168_v42 }
  0xf0   :  { %605 = vmatprep.mubr.msk.f32.mxu1 %vm667_vm2, %v668_v2 }
 0x1be   :  { %v579_v46 = vpop.f32.mrb[0].mxu1 }
 0x1bf   :  { %v278_v47 = vadd.f32 %v579_v46, %v181_v44  ;;  %v272_v48 = vpop.f32.mrb[1].mxu1 }
 0x1c0   :  { %v273_v49 = vadd.f32 %v272_v48, %v176_v45 }
 0x1c1   :  { %v292_v50 = vmax.f32 %v278_v47, 0.0 }
 0x1c2   :  { %v291_v52 = vmax.f32 %v273_v49, 0.0  ;;  %v582_v53 = vpop.f32.mrb[2].mxu1 }
 0x1c3   :  { %v288_v55 = vadd.f32 %v582_v53, %v191_v51  ;;  %v282_v56 = vpop.f32.mrb[3].mxu1 }
 0x1c4   :  { %v620_v57 = vpack.c.bf16 %v292_v50, %v291_v52  ;;  %v283_v58 = vadd.f32 %v282_v56, %v186_v54 }
 0x1c5   :  { %v294_v59 = vmax.f32 %v288_v55, 0.0 }
 0x1c6   :  { %v293_v60 = vmax.f32 %v283_v58, 0.0  ;;  %621 = vmatprep.subr.bf16.mxu0 %v620_v57 }
 0x1c7   :  { %623 = vmatpush3.bf16.msra.mxu0 %v620_v57 }
 0x1c8   :  { %v624_v61 = vpack.c.bf16 %v294_v59, %v293_v60 }
 0x1ca   :  { %625 = vmatprep.subr.bf16.mxu0 %v624_v61 }
 0x1cb   :  { %627 = vmatpush3.bf16.msra.mxu0 %v624_v61 }
 0x1ce   :  { %592 = vmatmul.mubr.msk.f32.vlgmr.msra.gmra.mrb[4].mxu0 %vm193_vm1, %v296_v62 }
 0x1cf   :  { %594 = vmatprep.mubr.msk.f32.mxu0 %vm193_vm1, %v297_v63 }
 0x1d2   :  { %595 = vmatmul.mubr.msk.f32.gmra.mrb[6].mxu0 %vm193_vm1, %v298_v0 }
 0x2a1   :  { %v593_v5 = vpop.f32.mrb[4].mxu0 }
 0x2a2   :  { %v407_v6 = vadd.f32 %v593_v5, %v311_v3  ;;  %v401_v7 = vpop.f32.mrb[5].mxu0 }
 0x2a3   :  { %v402_v8 = vadd.f32 %v401_v7, %v306_v4 }
 0x2a4   :  { %v421_v9 = vmax.f32 %v407_v6, 0.0 }
 0x2a5   :  { %v420_v11 = vmax.f32 %v402_v8, 0.0  ;;  %v596_v12 = vpop.f32.mrb[6].mxu0 }
 0x2a6   :  { %v417_v14 = vadd.f32 %v596_v12, %v321_v10  ;;  %v411_v15 = vpop.f32.mrb[7].mxu0 }
 0x2a7   :  { %v629_v16 = vpack.c.bf16 %v421_v9, %v420_v11  ;;  %v412_v17 = vadd.f32 %v411_v15, %v316_v13 }
 0x2a8   :  { %v423_v18 = vmax.f32 %v417_v14, 0.0 }
 0x2a9   :  { %v422_v19 = vmax.f32 %v412_v17, 0.0  ;;  %630 = vmatpush3.bf16.msra.mxu1 %v629_v16 }
 0x2aa   :  { %631 = vmatprep.subr.bf16.mxu1 %v666_v1 }
 0x2ab   :  { %v632_v20 = vpack.c.bf16 %v423_v18, %v422_v19 }
 0x2ad   :  { %633 = vmatpush3.bf16.msra.mxu1 %v632_v20 }
 0x2b0   :  { %606 = vmatmul.mubr.msk.f32.vlgmr.msra.gmra.mrb[4].mxu1 %vm193_vm1, %v424_v21 }
 0x383   :  { %v500_v23 = vpop.f32.mrb[4].mxu1 }
 0x384   :  { %v501_v24 = vadd.f32 %v500_v23, %v429_v22  ;;  %v607_v25 = vpop.f32.mrb[5].mxu1 }
 0x386   :  { %504 = vst [vmem:[#allocation2] sm:$0x3] %v501_v24 }
 0x387   :  { %652 = shalt.err (!%p649_p4)
}
 0x388   :  { %s653_s7 = scalar_lea.hbm %s838_s9, 32 }
 0x389   :  { %p654_p5 = scmp.ne.s32.totalorder %s838_s9, %s653_s7  ;;  %p657_p6 = scmp.lt.u32.totalorder %s653_s7, %s838_s9 }
 0x38b   :  { %p659_p7 = pnand %p657_p6, %p654_p5 }
 0x38d   :  { %662 = shalt.err (!%p659_p7)
}
 0x38e   :  { %514 = dma.vmem_to_hbm [thread:$0]  %s512_s1, 32, %s838_s9, [#allocation3]  }
 0x38f   :  { %663 = dma.done.wait [#allocation3], 32  }
 0x390   :  { %664 = vsyncadd [#allocation3], 4294967264 }
 0x391   :  { %518 = vsyncpa [#allocation3], 1 }

</bundles_post_ra>
